<compile_context>
chip_gen: v7x
topology: tpu7x:2x2x1
jax: 0.10.0
libtpu: 0.0.40
codegen_flags: <defaults>
</compile_context>

<pallas_src>
import jax
import jax.numpy as jnp
import numpy as np
from jax import lax
from jax.experimental import pallas as pl
from jax.experimental.pallas import tpu as pltpu


# ----------------------------------------------------------------------------
# Fused kernel: L2 normalization + cosine-similarity matmul.
#   q_ref   : (tile_n, D)     f32 raw shape embeddings (resident along M axis)
#   dbt_ref : (D, tile_m)     bf16 pre-normalized, pre-transposed DB tile
#   out_ref : (tile_n, tile_m) f32 cosine similarities
#
# sim = diag(1/max(||q||, eps)) @ (q @ db_t), so the normalization is applied
# as a per-row scale of the f32 accumulator tile (VPU mul), not as a separate
# pass over the queries.
# ----------------------------------------------------------------------------
def _fused_cosine_sim_kernel(q_ref, dbt_ref, out_ref):
    x = q_ref[...]                                             # f32 (tile_n, D)
    sq = jnp.sum(x * x, axis=-1, keepdims=True)
    # Clamp the *squared* norm at eps^2 so semantics match x / max(||x||, eps).
    inv = lax.rsqrt(jnp.maximum(sq, 1e-24))                    # (tile_n, 1)
    acc = jnp.dot(
        x.astype(jnp.bfloat16), dbt_ref[...],
        preferred_element_type=jnp.float32,
    )                                                          # (tile_n, tile_m)
    out_ref[...] = inv * acc                                   # scale + store


def _round_up(x, m):
    return (x + m - 1) // m * m


def _pick_tile_m(m, tile_n, d, *, vmem_budget_bytes=24 * 1024 * 1024):
    """Largest tile_m (divisor of M, multiple of 128) whose double-buffered
    working set fits the budget, while keeping >= 2 grid steps along M when
    possible so both v7x TensorCores get work."""
    for t in (8192, 4096, 2048, 1024, 512, 256, 128):
        if m % t:
            continue
        if m >= 256 and m // t < 2:
            continue                                   # keep grid >= 2 along M
        working = (
            2 * d * t * 2              # bf16 DB tile, double-buffered
            + 2 * tile_n * t * 4       # f32 output tile, double-buffered
            + 2 * tile_n * d * 4       # resident f32 query block
        )
        if working <= vmem_budget_bytes:
            return t
    # Fallback: single full-width block (legal full-array block). Silently
    # produces a 1-step M grid; acceptable for small / oddly sized databases.
    return m


def cosine_similarity_to_db(query, db_t, *, tile_m=None, tile_n=None):
    """sim[i, j] = <query[i] / max(||query[i]||, eps), db[:, j]>.

    query : (N, D) f32 raw shape embeddings (un-normalized).
    db_t  : (D, M) bf16 pre-normalized rendered-view embeddings, transposed.
    Returns (N, M) f32 cosine similarities.
    """
    n, d = query.shape
    d2, m = db_t.shape
    assert d == d2

    # Pad rows to a multiple of 16 so the bf16 MXU operand fills whole sublane
    # tiles; padded all-zero rows yield zero similarities and are sliced off.
    n_pad = max(16, _round_up(n, 16))
    if n_pad != n:
        query = jnp.pad(query, ((0, n_pad - n), (0, 0)))

    if tile_n is None:
        tile_n = n_pad if n_pad <= 512 else 512
    assert n_pad % tile_n == 0
    if tile_m is None:
        tile_m = _pick_tile_m(m, tile_n, d)
    assert m % tile_m == 0

    grid = (n_pad // tile_n, m // tile_m)

    # Derive the VMEM limit from the actual double-buffered working set so the
    # same code stays inside v7x's 64 MiB as well as v5e/v6e's 128 MiB.
    working = 2 * d * tile_m * 2 + 2 * tile_n * tile_m * 4 + 2 * tile_n * d * 4
    vmem_limit = int(
        min(48 * 1024 * 1024, max(working + 4 * 1024 * 1024, 8 * 1024 * 1024))
    )

    bytes_q = n_pad * d * 4
    bytes_db = d * m * 2
    bytes_out = n_pad * m * 4

    sim = pl.pallas_call(
        _fused_cosine_sim_kernel,
        out_shape=jax.ShapeDtypeStruct((n_pad, m), jnp.float32),
        grid_spec=pltpu.PrefetchScalarGridSpec(
            num_scalar_prefetch=0,
            grid=grid,
            in_specs=[
                pl.BlockSpec((tile_n, d), lambda i, j: (i, 0)),   # resident queries
                pl.BlockSpec((d, tile_m), lambda i, j: (0, j)),   # streamed DB tile
            ],
            out_specs=pl.BlockSpec((tile_n, tile_m), lambda i, j: (i, j)),
        ),
        compiler_params=pltpu.CompilerParams(
            dimension_semantics=("parallel", "parallel"),
            vmem_limit_bytes=vmem_limit,
        ),
        cost_estimate=pl.CostEstimate(
            flops=2 * n_pad * m * d,
            transcendentals=n_pad * (m // tile_m),
            bytes_accessed=bytes_q + bytes_db + bytes_out,
        ),
    )(query, db_t)

    return sim[:n] if n_pad != n else sim


# ----------------------------------------------------------------------------
# Mask2CAD shape-retrieval wrapper (database + forward hot path).
# ----------------------------------------------------------------------------
class Mask2CADShapeRetrieval:
    """Shape-retrieval database + forward hot path of Mask2CAD.

    The database of rendered-view embeddings (normally produced by the
    rendered_view_encoder over a shape dataset) is synthesized
    deterministically in-script, pre-normalized, and stored transposed (D, M)
    in bf16 so the similarity kernel streams it lane-contiguously into the MXU.
    """

    def __init__(self, key, num_db_views=256, dim=128, views_per_shape=4):
        emb = jax.random.normal(key, (num_db_views, dim), dtype=jnp.float32)
        sq = jnp.sum(emb * emb, axis=-1, keepdims=True)
        emb_n = emb * lax.rsqrt(jnp.maximum(sq, 1e-24))       # F.normalize
        self.db_embedding_t = emb_n.T.astype(jnp.bfloat16)    # (D, M) bf16
        base_idx = jnp.arange(num_db_views // views_per_shape, dtype=jnp.int32)
        self.shape_idx = jnp.repeat(base_idx, views_per_shape)
        self.shape_path = [f"shape_{int(i)}.obj" for i in np.asarray(self.shape_idx)]

    def forward(self, shape_embedding, topk=10):
        # Single fused Pallas kernel: normalize + cosine-sim matmul.
        sim = cosine_similarity_to_db(shape_embedding, self.db_embedding_t)
        _, idx = lax.top_k(sim, topk)
        gathered_idx = jnp.take(self.shape_idx, idx, axis=0)   # on-device gather
        idx_host = np.asarray(jax.device_get(idx))             # only for paths
        gathered_path = [self.shape_path[int(row[0])] for row in idx_host]
        return gathered_idx, gathered_path


# ----------------------------------------------------------------------------
# Demo / smoke test.
# ----------------------------------------------------------------------------
if __name__ == "__main__":
    key = jax.random.PRNGKey(0)
    k_db, k_q = jax.random.split(key)

    N, D, M, TOPK = 8, 128, 256, 10

    retrieval = Mask2CADShapeRetrieval(k_db, num_db_views=M, dim=D)
    query = jax.random.normal(k_q, (N, D), dtype=jnp.float32)

    gathered_idx, gathered_path = retrieval.forward(query, topk=TOPK)
    gathered_idx = jax.block_until_ready(gathered_idx)

    sim = jax.block_until_ready(
        cosine_similarity_to_db(query, retrieval.db_embedding_t)
    )

    # --- pure-JAX reference built from the exact operands the fused kernel
    # uses: bf16-rounded raw query into the MXU, f32 accumulation, then the
    # per-row inverse-norm scale applied to the f32 output tile.
    sq = jnp.sum(query * query, axis=-1, keepdims=True)
    inv = lax.rsqrt(jnp.maximum(sq, 1e-24))
    ref_sim = inv * jnp.dot(
        query.astype(jnp.bfloat16).astype(jnp.float32),
        retrieval.db_embedding_t.astype(jnp.float32),
    )

    # fused kernel matches reference
    assert sim.shape == (N, M) and sim.dtype == jnp.float32
    assert np.allclose(np.asarray(sim), np.asarray(ref_sim), atol=2e-3, rtol=0)

    # top-k retrieval check (robust to accumulation-order near-ties): the
    # reference similarity values at the kernel-selected columns must match
    # the reference top-k values.
    _, idx = lax.top_k(sim, TOPK)
    sel_ref_vals = jnp.take_along_axis(ref_sim, idx, axis=-1)
    ref_topk_vals, _ = lax.top_k(ref_sim, TOPK)
    assert np.allclose(
        np.sort(np.asarray(sel_ref_vals), axis=-1),
        np.sort(np.asarray(ref_topk_vals), axis=-1),
        atol=2e-3,
    )

    assert gathered_idx.shape == (N, TOPK)
    assert len(gathered_path) == N

    print("KERNEL_OK")
</pallas_src>

<mosaic_0001>
module attributes {stable_mosaic.version = 11 : i64} {
  func.func @_fused_cosine_sim_kernel(%arg0: i32, %arg1: i32, %arg2: memref<16x128xf32, #tpu.memory_space<vmem>>, %arg3: memref<128x128xbf16, #tpu.memory_space<vmem>>, %arg4: memref<16x128xf32, #tpu.memory_space<vmem>>) attributes {dimension_semantics = [#tpu.dimension_semantics<parallel>, #tpu.dimension_semantics<parallel>], iteration_bounds = array<i64: 1, 2>, scalar_prefetch = 0 : i64, scratch_operands = 0 : i64, tpu.core_type = #tpu.core_type<tc>, window_params = [{transform_indices = @transform_0, window_bounds = array<i64: 16, 128>}, {transform_indices = @transform_1, window_bounds = array<i64: 128, 128>}, {transform_indices = @transform_2, window_bounds = array<i64: 16, 128>}]} {
    %c0 = arith.constant 0 : index
    %c0_0 = arith.constant 0 : index
    %0 = vector.load %arg2[%c0, %c0_0] : memref<16x128xf32, #tpu.memory_space<vmem>>, vector<16x128xf32>
    %1 = arith.mulf %0, %0 : vector<16x128xf32>
    %cst = arith.constant dense<0.000000e+00> : vector<16xf32>
    %2 = vector.multi_reduction <add>, %1, %cst [1] : vector<16x128xf32> to vector<16xf32>
    %3 = vector.shape_cast %2 : vector<16xf32> to vector<16x1xf32>
    %cst_1 = arith.constant 1.000000e-24 : f32
    %4 = vector.broadcast %cst_1 : f32 to vector<16x1xf32>
    %5 = arith.maximumf %3, %4 : vector<16x1xf32>
    %6 = math.rsqrt %5 : vector<16x1xf32>
    %7 = arith.truncf %0 : vector<16x128xf32> to vector<16x128xbf16>
    %c0_2 = arith.constant 0 : index
    %c0_3 = arith.constant 0 : index
    %8 = vector.load %arg3[%c0_2, %c0_3] : memref<128x128xbf16, #tpu.memory_space<vmem>>, vector<128x128xbf16>
    %cst_4 = arith.constant dense<0.000000e+00> : vector<16x128xf32>
    %9 = tpu.matmul %7, %8, %cst_4 {dimension_numbers = #tpu.dot_dimension_numbers<[1], [0], [0], [1], [0, 0, 1, 1], [], []>} : vector<16x128xbf16>, vector<128x128xbf16>, vector<16x128xf32> -> vector<16x128xf32>
    %10 = vector.broadcast %6 : vector<16x1xf32> to vector<16x128xf32>
    %11 = arith.mulf %10, %9 : vector<16x128xf32>
    %c0_5 = arith.constant 0 : index
    %c0_6 = arith.constant 0 : index
    %12 = vector.load %arg4[%c0_5, %c0_6] : memref<16x128xf32, #tpu.memory_space<vmem>>, vector<16x128xf32>
    tpu.vector_store %arg4[%c0_5, %c0_6], %11 {strides = array<i32>} : memref<16x128xf32, #tpu.memory_space<vmem>>, vector<16x128xf32>,
    return
  }
  func.func @transform_0(%arg0: i32, %arg1: i32) -> (i32, i32) {
    %c0_i32 = arith.constant 0 : i32
    %c0_i32_0 = arith.constant 0 : i32
    return %arg0, %c0_i32 : i32, i32
  }
  func.func @transform_1(%arg0: i32, %arg1: i32) -> (i32, i32) {
    %c0_i32 = arith.constant 0 : i32
    %c0_i32_0 = arith.constant 0 : i32
    return %c0_i32, %arg1 : i32, i32
  }
  func.func @transform_2(%arg0: i32, %arg1: i32) -> (i32, i32) {
    %c0_i32 = arith.constant 0 : i32
    return %arg0, %arg1 : i32, i32
  }
}

</mosaic_0001>

<bundles_post_ra>
// kernel: tpu_custom_call.1
= control target key start
LH: loop header
LB: loop body
LE: loop exit
PB: predicated region body
PF: predicated region fallthrough
CT: control target
= control target key end

     0   :  { %7 = vsyncpa [#allocation3], 0  ;;  %s989_s0 = inlined_call_operand.hbm [shape: f32[16,128], index: 0, kind: input, shape index: {}]   ;;  %s990_s1 = inlined_call_operand.hbm [shape: bf16[128,256], index: 1, kind: input, shape index: {}]   ;;  %s991_s2 = inlined_call_operand.hbm [shape: f32[16,256], index: 2, kind: output, shape index: {}]  }
   0x1   :  { %8 = vsyncpa [#allocation6], 0 }
   0x2   :  { %10 = vsyncpa [#allocation6 + $0x1], 0 }
   0x3   :  { %11 = vsyncpa [#allocation4], 0 }
   0x4   :  { %13 = vsyncpa [#allocation4 + $0x1], 0  ;;  %s755_s9 = smov 0   ;;  %s757_s10 = smov 0  }
   0x5   :  { %s759_s11 = smov 0   ;;  %s761_s12 = smov 0  }
   0x6   :  { %s763_s13 = smov 0   ;;  %s765_s14 = smov 0  }
   0x7 LB: > { %s436_s15 = sadd.s32 4294967295, %s726_s14   ;;  %s437_s16 = sadd.s32 4294967294, %s726_s14   ;;  %s726_s14 = sphi %s765_s14, %s19_s14   ;;  %s722_s13 = sphi %s763_s13, %s1017_s13   ;;  %s718_s12 = sphi %s761_s12, %s1016_s12   ;;  %s714_s11 = sphi %s759_s11, %s1015_s11   ;;  %s710_s10 = sphi %s757_s10, %s1014_s10   ;;  %s706_s9 = sphi %s755_s9, %s1013_s9  }
   0x8   : > { %p71_p0 = scmp.ne.s32.totalorder %s714_s11, %s710_s10  ;;  %p72_p1 = scmp.eq.s32.totalorder %s726_s14, 0 }
   0x9   : > { %p77_p2 = scmp.ne.s32.totalorder %s710_s10, %s706_s9  ;;  %p792_p3 = scmp.eq.s32.totalorder %s436_s15, 0 }
   0xa   : > { %p796_p4 = por %p72_p1, %p71_p0  ;;  %p103_p5 = scmp.eq.s32.totalorder %s436_s15, 1 }
   0xb   : > { %s998_s17 = scalar_select %p792_p3, 1, 0 }
   0xc   : > { %p802_p6 = por %p792_p3, %p77_p2  ;;  %p109_p7 = scmp.eq.s32.totalorder %s437_s16, 1 }
   0xd   : > { %p806_p8 = por %p103_p5, %p71_p0  ;;  %p438_p9 = scmp.ge.s32.totalorder %s726_s14, 1 }
   0xe   : > { %s1000_s19 = scalar_select %p802_p6, 1, 0 }
   0xf   : > { %s1001_s20 = scalar_select %p806_p8, 1, 0 }
  0x10   : > { %p811_p10 = por %p109_p7, %p77_p2  ;;  %p116_p11 = scmp.lt.s32.totalorder %s726_s14, 3 }
  0x11   : > { %s728_s23 = smov [#allocation2]   ;;  %p509_p1 = scmp.lt.s32.totalorder %s726_s14, 2 }
  0x12   : > { %s1002_s21 = scalar_select %p811_p10, 1, 0 }
  0x13   : > { %p816_p12 = pnand %p438_p9, %p116_p11  ;;  %s131_s24 = sshll.u32 %s728_s23, 4  ;;  %s820_s24 = int_to_ptr.vmem [resolvable:$true] %s131_s24 }
  0x14   : > { %p834_p2 = pnand %p509_p1, %p796_p4  ;;  %s28_s27 = sadd.s32 1, %s722_s13 }
  0x15   : > { %s1003_s22 = scalar_select %p816_p12, 1, 0 }
  0x16   : > { %p496_p13 = pneg %p816_p12  ;;  %s582_s30 = scalar_lea.hbm %s989_s0, 256 }
  0x17   : > { %s1005_s26 = scalar_select %p834_p2, 1, 0 }
  0x18   : > { %p828_p5 = pnand %p496_p13, %p792_p3  ;;  %p583_p7 = scmp.ne.s32.totalorder %s989_s0, %s582_s30 }
  0x19   : > { %p589_p4 = scmp.lt.u32.totalorder %s582_s30, %s989_s0 }
  0x1a   : > { %p584_p9 = pneg %p828_p5 }
  0x1c   : > { %p585_p11 = pnand %p584_p9, %p583_p7 }
  0x1e   : > { %p586_p13 = pneg %p585_p11 }
  0x20   : > { %p591_p1 = pnand %p589_p4, %p586_p13 }
  0x22   : > { %594 = shalt.err (!%p591_p1)
}
  0x23   : > { %s595_s7 = scalar_lea.vmem %s820_s24, 256  ;;  %p603_p6 = scmp.lt.s32.totalorder %s820_s24, %s820_s24 }
  0x24   : > { %p596_p0 = scmp.ne.s32.totalorder %s820_s24, %s595_s7  ;;  %p604_p3 = scmp.lt.s32.totalorder %s595_s7, %s595_s7 }
  0x26   : > { %p598_p10 = pnand %p596_p0, %p584_p9  ;;  %p605_p12 = por %p604_p3, %p603_p6 }
  0x28   : > { %p599_p8 = pneg %p598_p10 }
  0x2a   : > { %p606_p2 = pnand %p605_p12, %p599_p8 }
  0x2c   : > { %609 = shalt.err (!%p606_p2)
}
  0x2d   : > { %s729_s8 = smov 128   ;;  %s730_s15 = smov 8  }
  0x2e   : > { %499 = dma.hbm_to_vmem [thread:$0]  (!%p828_p5), %s989_s0, 256, %s820_s24, [#allocation3], %s729_s8, %s729_s8, %s730_s15  }
  0x2f   : > { %p29_p10 = scmp.ge.s32.totalorder %s28_s27, 2  ;;  %s64_s23 = sadd.s32 1, %s714_s11 }
  0x30   : > { %s145_s28 = sand.u32 1, %s714_s11   ;;  %s442_s3 = sshll.u32 %s722_s13, 6 }
  0x31   : > { %s1019_s27 = smov (%p29_p10, %s28_s27), 0  ;;  %s441_s29 = sshll.u32 %s145_s28, 6 }
  0x32   : > { %s61_s30 = ssub.s32 %s722_s13, %s1019_s27  ;;  %s872_s5 = scalar_lea.hbm %s990_s1, %s442_s3 }
  0x33   : > { %p62_p3 = scmp.eq.s32.totalorder %s61_s30, 0  ;;  %s149_s24 = scalar_lea.vmem [#allocation5], %s441_s29 }
  0x34   : > { %s155_s6 = sshll.u32 %s149_s24, 4  ;;  %s879_s15 = scalar_lea.sflag [#allocation6], %s145_s28  ;;  %s877_s6 = int_to_ptr.vmem [resolvable:$true] %s155_s6 }
  0x35   : > { %s875_s7 = scalar_select %p62_p3, %s714_s11, %s64_s23  }
  0x36   : > { %s610_s16 = scalar_lea.hbm %s872_s5, 1024  ;;  %p1006_p8 = scmp.ne.s32.totalorder %s1005_s26, 0 }
  0x37   : > { %p611_p6 = scmp.ne.s32.totalorder %s872_s5, %s610_s16  ;;  %s615_s3 = scalar_lea.hbm %s990_s1, 2048 }
  0x38   : > { %p612_p12 = pneg %p1006_p8  ;;  %p616_p2 = scmp.lt.u32.totalorder %s872_s5, %s990_s1 }
  0x39   : > { %p617_p7 = scmp.lt.u32.totalorder %s615_s3, %s610_s16  ;;  %p619_p11 = scmp.lt.u32.totalorder %s610_s16, %s872_s5 }
  0x3a   : > { %p613_p0 = pnand %p612_p12, %p611_p6 }
  0x3b   : > { %p618_p9 = por %p617_p7, %p616_p2 }
  0x3c   : > { %p614_p5 = pneg %p613_p0 }
  0x3d   : > { %p620_p13 = por %p619_p11, %p618_p9 }
  0x3f   : > { %p621_p4 = pnand %p620_p13, %p614_p5 }
  0x41   : > { %624 = shalt.err (!%p621_p4)
}
  0x42   : > { %s625_s23 = scalar_lea.vmem %s877_s6, 1024  ;;  %s731_s28 = smov [#allocation5]  }
  0x43   : > { %p626_p1 = scmp.ne.s32.totalorder %s877_s6, %s625_s23  ;;  %s630_s25 = sshll.u32 %s731_s28, 4  ;;  %s631_s25 = int_to_ptr.vmem [resolvable:$false] %s630_s25 }
  0x44   : > { %s632_s24 = scalar_lea.vmem %s631_s25, 2048  ;;  %p633_p6 = scmp.lt.s32.totalorder %s877_s6, %s631_s25 }
  0x45   : > { %p628_p10 = pnand %p626_p1, %p612_p12  ;;  %p634_p0 = scmp.lt.s32.totalorder %s632_s24, %s625_s23 }
  0x47   : > { %p629_p3 = pneg %p628_p10  ;;  %p635_p2 = por %p634_p0, %p633_p6 }
  0x49   : > { %p636_p7 = pnand %p635_p2, %p629_p3 }
  0x4b   : > { %639 = shalt.err (!%p636_p7)
}
  0x4c   : > { %s732_s16 = smov 64   ;;  %s733_s18 = smov 4  }
  0x4d   : > { %503 = dma.hbm_to_vmem [thread:$0]  (!%p1006_p8), %s872_s5, 1024, %s877_s6, %s879_s15, %s729_s8, %s732_s16, %s733_s18  }
  0x4e   : > { %p1007_p12 = scmp.ne.s32.totalorder %s1003_s22, 0 }
  0x4f   : > { %p1008_p5 = scmp.ne.s32.totalorder (!%p1007_p12), %s998_s17, 0 }
  0x50   : > { %167 = sbr.rel (%p1007_p12) target bundleno = 357 (0x165), region = 28 }
  0x57   : > { %693 = dma.done.wait (%p1008_p5), [#allocation3], 256  }
  0x58   : > { %695 = vsyncadd (%p1008_p5), [#allocation3], 4294967040  ;;  %s915_s30 = sand.u32 1, %s710_s10   ;;  %p1009_p8 = scmp.ne.s32.totalorder %s1000_s19, 0 }
  0x59   : > { %s445_s3 = sshll.u32 %s915_s30, 6  ;;  %s174_s29 = scalar_lea.sflag [#allocation6], %s915_s30 }
  0x5a   : > { %s919_s26 = scalar_lea.vmem [#allocation5], %s445_s3 }
  0x5b   : > { %697 = dma.done.wait (%p1009_p8), %s174_s29, 1024  }
  0x5c   : > { %699 = vsyncadd (%p1009_p8), %s174_s29, 4294966272  ;;  %v734_v0 = vmov 0.0   ;;  %vm735_vm0 = vmmov 0   ;;  %v570_v1 = vld [vmem:[%s919_s26] sm:$0xff]   ;;  %v571_v2 = vld [vmem:[%s919_s26 + $0x8] sm:$0xff]   ;;  %s446_s17 = sshll.u32 %s915_s30, 4 }
  0x5d   : > { %468 = vmatprep.subr.bf16.mxu0 %v734_v0  ;;  %484 = vmatprep.mubr.msk.bf16.mxu0 %vm735_vm0, %v734_v0  ;;  %v572_v3 = vld [vmem:[%s919_s26 + $0x10] sm:$0xff]   ;;  %v573_v6 = vld [vmem:[%s919_s26 + $0x18] sm:$0xff]   ;;  %v574_v9 = vld [vmem:[%s919_s26 + $0x20] sm:$0xff]   ;;  %s197_s19 = scalar_lea.vmem [#allocation7], %s446_s17  ;;  %s456_s8 = sshll.u32 %s718_s12, 7 }
  0x5e   : > { %469 = vmatpush3.bf16.msra.mxu0 %v570_v1  ;;  %v201_v4 = vld [vmem:[#allocation2] sm:$0xff]  ;;  %v202_v7 = vld [vmem:[#allocation2 + $0x8] sm:$0xff]  ;;  %v575_v10 = vld [vmem:[%s919_s26 + $0x28] sm:$0xff]   ;;  %s339_s22 = sshll.u32 %s197_s19, 4  ;;  %s940_s15 = scalar_lea.hbm %s991_s2, %s456_s8  ;;  %s935_s22 = int_to_ptr.vmem [resolvable:$true] %s339_s22 }
  0x5f   : > { %470 = vmatprep.subr.bf16.mxu0 %v734_v0  ;;  %v203_v5 = vmul.f32 %v201_v4, %v201_v4  ;;  %v204_v8 = vmul.f32 %v202_v7, %v202_v7  ;;  %v576_v11 = vld [vmem:[%s919_s26 + $0x30] sm:$0xff]   ;;  %v577_v12 = vld [vmem:[%s919_s26 + $0x38] sm:$0xff]   ;;  %v213_v13 = vpack.c.bf16 %v202_v7, %v201_v4  ;;  %s324_s12 = scalar_lea.sflag [#allocation4], %s915_s30  ;;  %s640_s4 = scalar_lea.vmem %s935_s22, 256 }
  0x60   : > { %p641_p9 = scmp.ne.s32.totalorder %s935_s22, %s640_s4  ;;  %p1010_p11 = scmp.ne.s32.totalorder %s1001_s20, 0 }
  0x61   : > { %205 = vadd.xlane.f32.xlu0 %v203_v5  ;;  %s736_s23 = smov [#allocation7]  }
  0x62   : > { %471 = vmatpush3.bf16.msra.mxu0 %v571_v2  ;;  %p642_p13 = pnand %p641_p9, %p1010_p11  ;;  %s644_s28 = sshll.u32 %s736_s23, 4  ;;  %s645_s28 = int_to_ptr.vmem [resolvable:$false] %s644_s28 }
  0x63   : > { %472 = vmatprep.subr.bf16.mxu0 %v734_v0  ;;  %s646_s25 = scalar_lea.vmem %s645_s28, 512  ;;  %p647_p1 = scmp.lt.s32.totalorder %s935_s22, %s645_s28 }
  0x64   : > { %p643_p4 = pneg %p642_p13  ;;  %p648_p10 = scmp.lt.s32.totalorder %s646_s25, %s640_s4 }
  0x65   : > { %207 = vadd.xlane.f32.xlu0 %v204_v8 }
  0x66   : > { %473 = vmatpush3.bf16.msra.mxu0 %v572_v3  ;;  %p649_p3 = por %p648_p10, %p647_p1 }
  0x67   : > { %474 = vmatprep.subr.bf16.mxu0 %v734_v0 }
  0x68   : > { %p650_p6 = pnand %p649_p3, %p643_p4 }
  0x6a   : > { %475 = vmatpush3.bf16.msra.mxu0 %v573_v6 }
  0x6b   : > { %476 = vmatprep.subr.bf16.mxu0 %v734_v0 }
  0x6e   : > { %477 = vmatpush3.bf16.msra.mxu0 %v574_v9 }
  0x6f   : > { %478 = vmatprep.subr.bf16.mxu0 %v734_v0 }
  0x72   : > { %479 = vmatpush3.bf16.msra.mxu0 %v575_v10 }
  0x73   : > { %480 = vmatprep.subr.bf16.mxu0 %v734_v0 }
  0x76   : > { %481 = vmatpush3.bf16.msra.mxu0 %v576_v11 }
  0x77   : > { %482 = vmatprep.subr.bf16.mxu0 %v734_v0 }
  0x7a   : > { %483 = vmatpush3.bf16.msra.mxu0 %v577_v12 }
  0x7d   : > { %485 = vmatmul.mubr.bf16.vlgmr.msra.gmra.mrb[0].mxu0 %v213_v13 }
  0xee   : > { %v206_v14 = vpop.xlane.xlu0 %205 }
  0xef   : > { %v209_v16 = vmax.f32 %v206_v14, 1e-24 }
  0xf1   : > { %578 = vrsqrt.f32 %v209_v16 }
  0xf2   : > { %v208_v15 = vpop.xlane.xlu0 %207 }
  0xf3   : > { %v210_v17 = vmax.f32 %v208_v15, 1e-24 }
  0xf5   : > { %580 = vrsqrt.f32 %v210_v17 }
  0xfb   : > { %v579_v18 = vpop.eup %578 }
  0xff   : > { %v581_v19 = vpop.eup %580 }
 0x150   : > { %v312_v20 = vpop.f32.mrb[0].mxu0 }
 0x151   : > { %v319_v21 = vmul.f32 %v579_v18, %v312_v20  ;;  %v486_v22 = vpop.f32.mrb[1].mxu0 }
 0x152   : > { %v315_v23 = vpop.f32.mrb[2].mxu0 }
 0x153   : > { %321 = vst [vmem:[%s197_s19] sm:$0xff] %v319_v21  ;;  %v320_v24 = vmul.f32 %v581_v19, %v315_v23  ;;  %v487_v25 = vpop.f32.mrb[3].mxu0 }
 0x155   : > { %322 = vst [vmem:[%s197_s19 + $0x8] sm:$0xff] %v320_v24 }
 0x156   : > { %653 = shalt.err (!%p650_p6)
}
 0x157   : > { %s654_s24 = scalar_lea.hbm %s940_s15, 256  ;;  %s658_s3 = scalar_lea.hbm %s991_s2, 512 }
 0x158   : > { %p655_p0 = scmp.ne.s32.totalorder %s940_s15, %s654_s24  ;;  %p659_p12 = scmp.lt.u32.totalorder %s940_s15, %s991_s2 }
 0x159   : > { %p660_p5 = scmp.lt.u32.totalorder %s658_s3, %s654_s24  ;;  %p662_p9 = scmp.lt.u32.totalorder %s654_s24, %s940_s15 }
 0x15a   : > { %p656_p2 = pnand %p655_p0, %p1010_p11 }
 0x15b   : > { %p661_p8 = por %p660_p5, %p659_p12 }
 0x15c   : > { %p657_p7 = pneg %p656_p2 }
 0x15d   : > { %p663_p13 = por %p662_p9, %p661_p8 }
 0x15f   : > { %p664_p4 = pnand %p663_p13, %p657_p7 }
 0x161   : > { %667 = shalt.err (!%p664_p4)
}
 0x162   : > { %s737_s17 = smov 128   ;;  %s738_s19 = smov 256  }
 0x163   : > { %s739_s8 = smov 8  }
 0x164   : > { %494 = dma.vmem_to_hbm [thread:$0]  (%p1010_p11), %s935_s22, 256, %s940_s15, %s324_s12, %s737_s17, %s738_s19, %s739_s8  }
 0x165 PF: > { %s354_s5 = sand.u32 1, %s706_s9   ;;  %p1011_p1 = scmp.ne.s32.totalorder %s1002_s21, 0 }
 0x166   : > { %p1012_p10 = scmp.ge.s32.totalorder %s726_s14, 2  ;;  %s355_s6 = scalar_lea.sflag [#allocation4], %s354_s5 }
 0x168   : > { %p505_p3 = pnand %p1012_p10, %p1011_p1 }
 0x16a   : > { %701 = dma.done.wait (!%p505_p3), %s355_s6, 256  }
 0x16b   : > { %703 = vsyncadd (!%p505_p3), %s355_s6, 4294967040  ;;  %s19_s14 = sadd.s32 1, %s726_s14   ;;  %s1013_s9 = smov %s710_s10 }
 0x16c   : > { %p16_p6 = scmp.ge.s32.totalorder %s19_s14, 4   ;;  %s1014_s10 = smov %s714_s11 }
 0x16d   : > { %s1015_s11 = smov %s875_s7  ;;  %s1016_s12 = smov %s722_s13 }
 0x16e   : > { %s1017_s13 = smov %s1019_s27  ;;  %18 = sbr.rel (!%p16_p6) target bundleno = 7 (0x7), region = 79 }
 0x175   :  { %360 = vsyncpa [#allocation3], 1 }
 0x176   :  { %362 = vsyncpa [#allocation3 + $0x1], 1 }
 0x177   :  { %363 = vsyncpa [#allocation6], 1 }
 0x178   :  { %365 = vsyncpa [#allocation6 + $0x1], 1 }
 0x179   :  { %366 = vsyncpa [#allocation4], 1 }
 0x17a   :  { %368 = vsyncpa [#allocation4 + $0x1], 1 }

</bundles_post_ra>
